<compile_context>
chip_gen: v7x
topology: tpu7x:2x2x1
jax: 0.10.0
libtpu: 0.0.40
codegen_flags: <defaults>
</compile_context>

<pallas_src>
import functools
import math

import jax
import jax.numpy as jnp
from jax import lax
from jax.experimental import pallas as pl
from jax.experimental.pallas import tpu as pltpu

_LANES = 128


def _fmix32(h):
    """murmur3 finalizer: high-quality stateless 32-bit mix (uint32 in/out)."""
    h = h ^ (h >> 16)
    h = h * jnp.uint32(0x85EBCA6B)
    h = h ^ (h >> 13)
    h = h * jnp.uint32(0xC2B2AE35)
    h = h ^ (h >> 16)
    return h


def _keep_mask(word_idx_i32, seed_i32, threshold31):
    """Bernoulli(1 - p) keep decision per word index (bool array)."""
    h = _fmix32(word_idx_i32.astype(jnp.uint32) ^ seed_i32.astype(jnp.uint32))
    u31 = (h & jnp.uint32(0x7FFFFFFF)).astype(jnp.int32)   # uniform in [0, 2^31)
    return u31 >= jnp.int32(threshold31)                    # P(keep) = 1 - p


def _rows_kernel(seed_ref, x_ref, o_ref, *, threshold31):
    """Fast path (D % 128 == 0): one tile = (tm, D) of words x embedding."""
    rows = x_ref.shape[0]
    w = pl.program_id(0) * rows + lax.broadcasted_iota(jnp.int32, (rows, 1), 0)
    keep = _keep_mask(w, seed_ref[0], threshold31)           # (rows, 1), broadcast over D
    o_ref[...] = jnp.where(keep, x_ref[...], jnp.zeros((), o_ref.dtype))


def _flat_kernel(seed_ref, x_ref, o_ref, *, threshold31, d, d_shift):
    """Lane-dense path: tensor flattened to (rows, 128); word = flat_index // D."""
    rows, lanes = x_ref.shape
    r = lax.broadcasted_iota(jnp.int32, (rows, lanes), 0)
    c = lax.broadcasted_iota(jnp.int32, (rows, lanes), 1)
    # Global flat element index (int32: assumes < 2^31 elements, i.e. < 8 GiB f32).
    e = (pl.program_id(0) * rows + r) * lanes + c
    if d == 1:
        w = e
    elif d_shift is not None:
        w = e >> d_shift                                     # D power of two -> shift
    else:
        w = e // d
    keep = _keep_mask(w, seed_ref[0], threshold31)
    o_ref[...] = jnp.where(keep, x_ref[...], jnp.zeros((), o_ref.dtype))


def _vmem_budgets():
    """(rows-path IO budget, flat-path IO budget, vmem_limit) bytes, per generation."""
    cap = 64 * 1024 * 1024
    try:
        if jax.devices()[0].platform == "tpu":
            cap = int(pltpu.get_tpu_info().vmem_capacity_bytes)
    except Exception:
        pass
    if cap >= 96 * 1024 * 1024:
        # v5e / v6e: 128 MiB physical VMEM -> bigger tiles, raised scoped limit.
        return 12 * 1024 * 1024, 6 * 1024 * 1024, 96 * 1024 * 1024
    # v7x (64 MiB VMEM) or unknown: conservative budgets.
    return 6 * 1024 * 1024, 3 * 1024 * 1024, 48 * 1024 * 1024


def _choose_tile_rows(total_rows, row_bytes, io_budget):
    """Largest sublane-aligned row-tile within the byte budget, preferring >= 8 grid steps."""
    tm = max(8, io_budget // row_bytes)
    min_rows = max(8, (1 << 20) // row_bytes)   # keep tiles >= ~1 MiB (per-step overhead knee)
    eight_way = -(-total_rows // 8)             # >= 8 steps for balanced 2-TC sharding on v7x
    tm = min(tm, max(min_rows, eight_way))
    if tm >= total_rows:
        return total_rows                        # single full-extent block
    return max(8, (tm // 8) * 8)


def _call(kernel, x2, seed_arr, tm, vmem_limit):
    n_rows, width = x2.shape
    grid = (pl.cdiv(n_rows, tm),)
    return pl.pallas_call(
        kernel,
        out_shape=jax.ShapeDtypeStruct(x2.shape, x2.dtype),
        grid_spec=pltpu.PrefetchScalarGridSpec(
            num_scalar_prefetch=1,
            grid=grid,
            in_specs=[pl.BlockSpec((tm, width), lambda i, seed: (i, 0))],
            out_specs=pl.BlockSpec((tm, width), lambda i, seed: (i, 0)),
            # TODO(synk): sweep pipeline_mode=pl.Buffered(3) on v7x (short DMAs vs fixed step cost).
        ),
        compiler_params=pltpu.CompilerParams(
            # Steps are independent (stateless hash) -> "parallel" lets v7x's two
            # TensorCores split the grid; near-neutral on single-core v5e/v6e.
            dimension_semantics=("parallel",),
            vmem_limit_bytes=vmem_limit,
        ),
    )(seed_arr, x2)


def word_dropout(x, seed, dropout_rate=0.05, training=True):
    """WordDropout forward: drops whole (batch, seq) words; no 1/(1-p) rescale."""
    if not training or not dropout_rate:        # static flags, as in the nn.Module
        return x
    if x.ndim < 2:
        raise ValueError("WordDropout expects x with at least (batch, seq) dims")

    n_words = x.shape[0] * x.shape[1]
    d = int(math.prod(x.shape[2:]))             # embedding size per word (1 for rank-2 x)
    if n_words == 0 or d == 0:
        return x

    # Keep iff 31-bit hash >= threshold; threshold = round(p * 2^31).
    threshold31 = min(int(round(float(dropout_rate) * (1 << 31))), (1 << 31) - 1)
    if isinstance(seed, int):
        seed = seed & 0x7FFFFFFF
    seed_arr = jnp.asarray(seed, dtype=jnp.int32).reshape((1,))

    rows_budget, flat_budget, vmem_limit = _vmem_budgets()
    itemsize = jnp.dtype(x.dtype).itemsize

    if d % _LANES == 0:
        # Fast path: embedding dim already lane-dense -> per-word mask, no repack.
        x2 = x.reshape(n_words, d)
        tm = _choose_tile_rows(n_words, d * itemsize, rows_budget)
        kernel = functools.partial(_rows_kernel, threshold31=threshold31)
        out2 = _call(kernel, x2, seed_arr, tm, vmem_limit)
        return out2.reshape(x.shape)

    # General path (d == 1, d == 32, ...): repack to a flat lane-dense (rows, 128)
    # layout so stores are full-width vst instead of masked vst.msk at d/128 lane
    # utilization.  Word identity is recovered in-kernel as flat_index // d.
    total = n_words * d
    pad = (-total) % _LANES                     # only non-multiple-of-128 totals pay a pad copy
    flat = x.reshape(total)
    if pad:
        flat = jnp.pad(flat, (0, pad))
    n_rows = (total + pad) // _LANES
    x2 = flat.reshape(n_rows, _LANES)

    d_shift = (d.bit_length() - 1) if (d & (d - 1)) == 0 else None
    tm = _choose_tile_rows(n_rows, _LANES * itemsize, flat_budget)
    kernel = functools.partial(_flat_kernel, threshold31=threshold31, d=d, d_shift=d_shift)
    out2 = _call(kernel, x2, seed_arr, tm, vmem_limit)

    out_flat = out2.reshape(n_rows * _LANES)
    if pad:
        out_flat = out_flat[:total]
    return out_flat.reshape(x.shape)


if __name__ == "__main__":
    key = jax.random.PRNGKey(0)

    # Primary demo shape: (batch=2, seq=8, hidden=32) -> lane-dense repack path.
    B, S, D = 2, 8, 32
    x = jax.random.normal(key, (B, S, D), dtype=jnp.float32)
    y = jax.block_until_ready(word_dropout(x, seed=1234, dropout_rate=0.05, training=True))
    assert y.shape == x.shape and y.dtype == x.dtype
    row_zero = jnp.all(y == 0.0, axis=-1)
    row_keep = jnp.all(y == x, axis=-1)
    assert bool(jnp.all(row_zero | row_keep))          # whole-word drop, no rescaling

    # Deterministic for a fixed seed (mask is a pure hash of (seed, word index)).
    y2 = jax.block_until_ready(word_dropout(x, seed=1234, dropout_rate=0.05, training=True))
    assert bool(jnp.all(y == y2))

    # Fast path: embedding dim that is a multiple of 128 (production-like).
    xe = jax.random.normal(jax.random.PRNGKey(1), (2, 8, 128), dtype=jnp.float32)
    ye = jax.block_until_ready(word_dropout(xe, seed=7, dropout_rate=0.5, training=True))
    rz = jnp.all(ye == 0.0, axis=-1)
    rk = jnp.all(ye == xe, axis=-1)
    assert bool(jnp.all(rz | rk))

    # Rank-2 input (D == 1): per-(b, s) scalar dropout via the flat path.
    x2d = jax.random.normal(jax.random.PRNGKey(2), (4, 256), dtype=jnp.float32)
    y2d = jax.block_until_ready(word_dropout(x2d, seed=99, dropout_rate=0.25, training=True))
    assert bool(jnp.all((y2d == x2d) | (y2d == 0.0)))

    # Eval / zero-rate paths return the input unchanged.
    assert word_dropout(x, seed=1234, dropout_rate=0.05, training=False) is x
    assert word_dropout(x, seed=1234, dropout_rate=0.0, training=True) is x

    print("KERNEL_OK")
</pallas_src>

<mosaic_0001>
module attributes {stable_mosaic.version = 11 : i64} {
  func.func @_flat_kernel(%arg0: i32, %arg1: memref<1xi32, #tpu.memory_space<smem>>, %arg2: memref<4x128xf32, #tpu.memory_space<vmem>>, %arg3: memref<4x128xf32, #tpu.memory_space<vmem>>) attributes {dimension_semantics = [#tpu.dimension_semantics<parallel>], iteration_bounds = array<i64: 1>, scalar_prefetch = 1 : i64, scratch_operands = 0 : i64, tpu.core_type = #tpu.core_type<tc>, window_params = [{transform_indices = @transform_0, window_bounds = array<i64: 4, 128>}, {transform_indices = @transform_1, window_bounds = array<i64: 4, 128>}]} {
    %0 = tpu.iota {dimensions = array<i32: 0>} : vector<4x128xi32>
    %1 = tpu.iota {dimensions = array<i32: 1>} : vector<4x128xi32>
    %c4_i32 = arith.constant 4 : i32
    %2 = arith.muli %arg0, %c4_i32 : i32
    %3 = vector.broadcast %2 : i32 to vector<4x128xi32>
    %4 = arith.addi %3, %0 : vector<4x128xi32>
    %c128_i32 = arith.constant 128 : i32
    %5 = vector.broadcast %c128_i32 : i32 to vector<4x128xi32>
    %6 = arith.muli %4, %5 : vector<4x128xi32>
    %7 = arith.addi %6, %1 : vector<4x128xi32>
    %c5_i32 = arith.constant 5 : i32
    %8 = vector.broadcast %c5_i32 : i32 to vector<4x128xi32>
    %9 = arith.shrsi %7, %8 : vector<4x128xi32>
    %c0 = arith.constant 0 : index
    %10 = memref.load %arg1[%c0] : memref<1xi32, #tpu.memory_space<smem>>
    %11 = vector.broadcast %10 : i32 to vector<4x128xi32>
    %12 = arith.xori %9, %11 : vector<4x128xi32>
    %c16_i32 = arith.constant 16 : i32
    %13 = vector.broadcast %c16_i32 : i32 to vector<4x128xi32>
    %14 = arith.shrui %12, %13 : vector<4x128xi32>
    %15 = arith.xori %12, %14 : vector<4x128xi32>
    %c-2048144789_i32 = arith.constant -2048144789 : i32
    %16 = vector.broadcast %c-2048144789_i32 : i32 to vector<4x128xi32>
    %17 = arith.muli %15, %16 : vector<4x128xi32>
    %c13_i32 = arith.constant 13 : i32
    %18 = vector.broadcast %c13_i32 : i32 to vector<4x128xi32>
    %19 = arith.shrui %17, %18 : vector<4x128xi32>
    %20 = arith.xori %17, %19 : vector<4x128xi32>
    %c-1028477387_i32 = arith.constant -1028477387 : i32
    %21 = vector.broadcast %c-1028477387_i32 : i32 to vector<4x128xi32>
    %22 = arith.muli %20, %21 : vector<4x128xi32>
    %c16_i32_0 = arith.constant 16 : i32
    %23 = vector.broadcast %c16_i32_0 : i32 to vector<4x128xi32>
    %24 = arith.shrui %22, %23 : vector<4x128xi32>
    %25 = arith.xori %22, %24 : vector<4x128xi32>
    %c2147483647_i32 = arith.constant 2147483647 : i32
    %26 = vector.broadcast %c2147483647_i32 : i32 to vector<4x128xi32>
    %27 = arith.andi %25, %26 : vector<4x128xi32>
    %c107374182_i32 = arith.constant 107374182 : i32
    %28 = vector.broadcast %c107374182_i32 : i32 to vector<4x128xi32>
    %29 = arith.cmpi sge, %27, %28 : vector<4x128xi32>
    %c0_1 = arith.constant 0 : index
    %c0_2 = arith.constant 0 : index
    %30 = vector.load %arg2[%c0_1, %c0_2] : memref<4x128xf32, #tpu.memory_space<vmem>>, vector<4x128xf32>
    %cst = arith.constant 0.000000e+00 : f32
    %31 = vector.broadcast %cst : f32 to vector<4x128xf32>
    %32 = arith.select %29, %30, %31 : vector<4x128xi1>, vector<4x128xf32>
    %c0_3 = arith.constant 0 : index
    %c0_4 = arith.constant 0 : index
    %33 = vector.load %arg3[%c0_3, %c0_4] : memref<4x128xf32, #tpu.memory_space<vmem>>, vector<4x128xf32>
    tpu.vector_store %arg3[%c0_3, %c0_4], %32 {strides = array<i32>} : memref<4x128xf32, #tpu.memory_space<vmem>>, vector<4x128xf32>,
    return
  }
  func.func @transform_0(%arg0: i32, %arg1: memref<1xi32, #tpu.memory_space<smem>>) -> (i32, i32) {
    %c0_i32 = arith.constant 0 : i32
    %c0_i32_0 = arith.constant 0 : i32
    return %arg0, %c0_i32 : i32, i32
  }
  func.func @transform_1(%arg0: i32, %arg1: memref<1xi32, #tpu.memory_space<smem>>) -> (i32, i32) {
    %c0_i32 = arith.constant 0 : i32
    %c0_i32_0 = arith.constant 0 : i32
    return %arg0, %c0_i32 : i32, i32
  }
}

</mosaic_0001>

<bundles_post_ra>
// kernel: tpu_custom_call.1
= control target key start
LH: loop header
LB: loop body
LE: loop exit
PB: predicated region body
PF: predicated region fallthrough
CT: control target
= control target key end

     0   :  { %8 = vsyncpa [#allocation5], 0  ;;  %s158_s0 = inlined_call_operand.<no memory space> [shape: s32[1], index: 0, kind: input, shape index: {}]   ;;  %s159_s1 = inlined_call_operand.hbm [shape: f32[4,128], index: 1, kind: input, shape index: {}]   ;;  %s160_s2 = inlined_call_operand.hbm [shape: f32[4,128], index: 2, kind: output, shape index: {}]  }
   0x1   :  { %9 = vsyncpa [#allocation6], 0  ;;  %s114_s9 = smov [#allocation4]   ;;  %s66_s13 = scalar_lea.hbm %s159_s1, 64 }
   0x2   :  { %s16_s10 = sshll.u32 %s114_s9, 4  ;;  %p67_p0 = scmp.ne.s32.totalorder %s159_s1, %s66_s13  ;;  %s17_s10 = int_to_ptr.vmem [resolvable:$true] %s16_s10 }
   0x3   :  { %p70_p1 = scmp.lt.u32.totalorder %s66_s13, %s159_s1 }
   0x5   :  { %p72_p2 = pnand %p70_p1, %p67_p0 }
   0x7   :  { %75 = shalt.err (!%p72_p2)
}
   0x8   :  { %s76_s18 = scalar_lea.vmem %s17_s10, 64  ;;  %p81_p4 = scmp.lt.s32.totalorder %s17_s10, %s17_s10 }
   0x9   :  { %p77_p3 = scmp.ne.s32.totalorder %s17_s10, %s76_s18  ;;  %p82_p5 = scmp.lt.s32.totalorder %s76_s18, %s76_s18 }
   0xb   :  { %p83_p6 = por %p82_p5, %p81_p4 }
   0xd   :  { %p84_p7 = pnand %p83_p6, %p77_p3 }
   0xf   :  { %87 = shalt.err (!%p84_p7)
}
  0x10   :  { %19 = dma.hbm_to_vmem [thread:$0]  %s159_s1, 64, %s17_s10, [#allocation5]  }
  0x11   :  { %110 = dma.done.wait [#allocation5], 64  }
  0x12   :  { %111 = vsyncadd [#allocation5], 4294967232  ;;  %v23_v0 = vlaneseq  ;;  %v34_v5 = vstv %s158_s0  ;;  %s115_s1 = smov [#allocation7]   ;;  %v46_v17 = vld [vmem:[#allocation4] sm:$0xf] }
  0x13   :  { %s55_s23 = sshll.u32 %s115_s1, 4  ;;  %s56_s23 = int_to_ptr.vmem [resolvable:$true] %s55_s23 }
  0x14   :  { %v24_v1 = vshrl.u32 %v23_v0, 7  ;;  %v26_v2 = vand.u32 127, %v23_v0  ;;  %s88_s24 = scalar_lea.vmem %s56_s23, 64  ;;  %p93_p9 = scmp.lt.s32.totalorder %s56_s23, %s56_s23 }
  0x15   :  { %p89_p8 = scmp.ne.s32.totalorder %s56_s23, %s88_s24  ;;  %p94_p10 = scmp.lt.s32.totalorder %s88_s24, %s88_s24 }
  0x16   :  { %v30_v3 = vmul.u32 128, %v24_v1 }
  0x17   :  { %p95_p11 = por %p94_p10, %p93_p9 }
  0x18   :  { %v31_v4 = vadd.s32 %v30_v3, %v26_v2 }
  0x19   :  { %p96_p12 = pnand %p95_p11, %p89_p8 }
  0x1a   :  { %v32_v6 = vshra.s32 %v31_v4, 5 }
  0x1c   :  { %v35_v7 = vxor.u32 %v34_v5, %v32_v6 }
  0x1e   :  { %v36_v8 = vshrl.u32 %v35_v7, 16 }
  0x20   :  { %v37_v9 = vxor.u32 %v36_v8, %v35_v7 }
  0x22   :  { %v38_v10 = vmul.u32 2246822507, %v37_v9 }
  0x24   :  { %v39_v11 = vshrl.u32 %v38_v10, 13 }
  0x26   :  { %v40_v12 = vxor.u32 %v39_v11, %v38_v10 }
  0x28   :  { %v41_v13 = vmul.u32 3266489909, %v40_v12 }
  0x2a   :  { %v42_v14 = vshrl.u32 %v41_v13, 16 }
  0x2c   :  { %v43_v15 = vxor.u32 %v42_v14, %v41_v13 }
  0x2e   :  { %v44_v16 = vand.u32 2147483647, %v43_v15 }
  0x30   :  { %vm45_vm0 = vcmp.ge.s32.totalorder %v44_v16, 107374182 }
  0x31   :  { %v47_v18 = vsel %vm45_vm0, %v46_v17, 0.0 }
  0x32   :  { %48 = vst [vmem:[#allocation7] sm:$0xf] %v47_v18 }
  0x33   :  { %99 = shalt.err (!%p96_p12)
}
  0x34   :  { %s100_s26 = scalar_lea.hbm %s160_s2, 64 }
  0x35   :  { %p101_p13 = scmp.ne.s32.totalorder %s160_s2, %s100_s26  ;;  %p104_p0 = scmp.lt.u32.totalorder %s100_s26, %s160_s2 }
  0x37   :  { %p106_p1 = pnand %p104_p0, %p101_p13 }
  0x39   :  { %109 = shalt.err (!%p106_p1)
}
  0x3a   :  { %58 = dma.vmem_to_hbm [thread:$0]  %s56_s23, 64, %s160_s2, [#allocation6]  }
  0x3b   :  { %112 = dma.done.wait [#allocation6], 64  }
  0x3c   :  { %113 = vsyncadd [#allocation6], 4294967232 }
  0x3d   :  { %62 = vsyncpa [#allocation5], 1 }
  0x3e   :  { %63 = vsyncpa [#allocation6], 1 }

</bundles_post_ra>
